<compile_context>
chip_gen: v5e
topology: v5e:2x2
jax: 0.10.0
libtpu: 0.0.40
codegen_flags: <defaults>
</compile_context>

<pallas_src>
import functools

import jax
import jax.numpy as jnp
from jax.experimental import pallas as pl
from jax.experimental.pallas import tpu as pltpu

_LANES = 128
_SUBLANES = 8
_MIN_SUBLANES = {4: 8, 2: 16, 1: 32}   # min row alignment per itemsize


def _bce_kernel(x_ref, y_ref, out_ref, *, tile_rows, bpc, full_rows, rem,
                num_full_blocks):
    # x_ref, y_ref : VMEM (tile_rows, 128) logits / labels (native dtype)
    # out_ref      : VMEM (8, 128) per-core lane/sublane-partial sums (f32)
    c = pl.program_id(0)            # parallel ("core") axis
    i = pl.program_id(1)            # serial reduction axis (per core)
    logical_block = c * bpc + i     # un-clamped logical row-block index

    @pl.when(i == 0)
    def _():
        out_ref[...] = jnp.zeros(out_ref.shape, out_ref.dtype)

    x = x_ref[...].astype(jnp.float32)
    y = y_ref[...].astype(jnp.float32)
    # y*log(sigmoid(x)) + (1-y)*log(1-sigmoid(x)) == y*x - softplus(x)
    softplus = jnp.maximum(x, 0.0) + jnp.log1p(jnp.exp(-jnp.abs(x)))
    term = y * x - softplus

    tr, lanes = term.shape

    def _accumulate(t):
        # Sublane-aligned partial sums: (tr,128)->(tr//8,8,128), VALU adds only;
        # the single cross-lane reduce happens in the wrapper.
        out_ref[...] += jnp.sum(
            t.reshape(tr // _SUBLANES, _SUBLANES, lanes), axis=0)

    @pl.when(logical_block < num_full_blocks)
    def _():
        # Fully-valid block: no masking, no iotas.
        _accumulate(term)

    @pl.when(logical_block >= num_full_blocks)
    def _():
        # Boundary / padded / duplicated block: mask padded lanes, padded rows,
        # stale rows of a partial DMA, and clamped duplicate blocks.
        row = (jax.lax.broadcasted_iota(jnp.int32, (tr, lanes), 0)
               + logical_block * tile_rows)
        col = jax.lax.broadcasted_iota(jnp.int32, (tr, lanes), 1)
        valid = (row < full_rows) | ((row == full_rows) & (col < rem))
        _accumulate(jnp.where(valid, term, 0.0))


def _canon(a):
    a = jnp.asarray(a)
    if a.dtype in (jnp.float32, jnp.bfloat16):
        return a
    return a.astype(jnp.float32)


def shdlnet_cross(x, y, lamd=1.0, *, max_tile_rows=4096):
    """Pallas implementation of SHDLNet_Cross.forward(x, y, lamd)."""
    x = _canon(x)
    y = _canon(y)
    y2 = y.reshape(-1, 1)                       # torch: y.view((-1, 1))
    # TODO(synk): for multi-column x (C > 1) replicate y inside the kernel
    # instead of materializing the broadcast (saves (C-1)/C of the y traffic).
    xb, yb = jnp.broadcast_arrays(x, y2)        # no-op copies for the (N,1) case

    x_flat = xb.reshape(-1)
    y_flat = yb.reshape(-1)
    n = x_flat.shape[0]
    if n == 0:
        return jnp.float32(jnp.nan)             # torch.mean over empty -> nan

    sub_align = max(_MIN_SUBLANES[x_flat.dtype.itemsize],
                    _MIN_SUBLANES[y_flat.dtype.itemsize])
    full_rows, rem = divmod(n, _LANES)          # fully-valid rows / ragged lanes
    rows_data = -(-n // _LANES)

    if rem == 0 and full_rows >= sub_align:
        # Fast path: free metadata reshape, zero extra HBM traffic.
        rows_slab = full_rows
        x_slab = x_flat.reshape(rows_slab, _LANES)
        y_slab = y_flat.reshape(rows_slab, _LANES)
    else:
        # Ragged / tiny case: minimal zero-pad (in-kernel mask handles the tail).
        rows_slab = max(sub_align, -(-rows_data // sub_align) * sub_align)
        pad = rows_slab * _LANES - n
        x_slab = jnp.pad(x_flat, (0, pad)).reshape(rows_slab, _LANES)
        y_slab = jnp.pad(y_flat, (0, pad)).reshape(rows_slab, _LANES)

    tile_rows = max(sub_align,
                    (min(max_tile_rows, rows_slab) // sub_align) * sub_align)
    nblocks = -(-rows_slab // tile_rows)        # real row-blocks
    num_cores = 2 if nblocks >= 2 else 1        # split reduction on v7x (2 TCs)
    bpc = -(-nblocks // num_cores)              # blocks per core
    num_full_blocks = full_rows // tile_rows    # blocks needing no tail mask

    kernel = functools.partial(
        _bce_kernel, tile_rows=tile_rows, bpc=bpc, full_rows=full_rows,
        rem=rem, num_full_blocks=num_full_blocks)

    def in_index_map(c, i):
        # Clamp so out-of-range logical blocks re-read the last real block
        # (their contribution is masked to zero in the kernel).
        return (jnp.minimum(c * bpc + i, nblocks - 1), 0)

    elem_bytes = x_slab.dtype.itemsize + y_slab.dtype.itemsize
    buf_bytes = 2 * tile_rows * _LANES * elem_bytes     # double-buffered inputs
    vmem_limit = max(32 * 1024 * 1024, buf_bytes + (8 << 20))

    partials = pl.pallas_call(
        kernel,
        out_shape=jax.ShapeDtypeStruct((num_cores, _SUBLANES, _LANES),
                                       jnp.float32),
        grid=(num_cores, bpc),
        in_specs=[
            pl.BlockSpec((tile_rows, _LANES), in_index_map),
            pl.BlockSpec((tile_rows, _LANES), in_index_map),
        ],
        out_specs=pl.BlockSpec((None, _SUBLANES, _LANES),
                               lambda c, i: (c, 0, 0)),
        compiler_params=pltpu.CompilerParams(
            dimension_semantics=("parallel", "arbitrary"),
            vmem_limit_bytes=vmem_limit),
        cost_estimate=pl.CostEstimate(
            flops=10 * n, transcendentals=2 * n,
            bytes_accessed=n * elem_bytes
            + 4 * num_cores * _SUBLANES * _LANES),
    )(x_slab, y_slab)

    total = jnp.sum(partials)
    return -(jnp.asarray(lamd, jnp.float32) * total) / jnp.float32(n)


def _reference(x, y, lamd=1.0):
    xf = jnp.asarray(x, jnp.float32)
    logt = jax.nn.sigmoid(xf)
    y2 = jnp.asarray(y, jnp.float32).reshape(-1, 1)
    return -jnp.mean(lamd * (y2 * jnp.log(logt) + (1.0 - y2) * jnp.log(1.0 - logt)))


if __name__ == "__main__":
    key = jax.random.PRNGKey(0)
    k1, k2, k3, k4, k5, k6, k7, k8 = jax.random.split(key, 8)

    # 1) Tiny (N,1) case matching the module's typical usage (ragged slow path).
    x1 = jax.random.normal(k1, (16, 1), dtype=jnp.float32)
    y1 = (jax.random.uniform(k2, (16,)) > 0.5).astype(jnp.float32)
    l1 = shdlnet_cross(x1, y1, lamd=1.0)
    jax.block_until_ready(l1)
    r1 = _reference(x1, y1, lamd=1.0)
    assert jnp.allclose(l1, r1, rtol=1e-5, atol=1e-6), (l1, r1)

    # 2) Lane-aligned fast path (zero-copy), forced multi-block dual-core split.
    x2 = jax.random.normal(k3, (2048, 1), dtype=jnp.float32)
    y2 = (jax.random.uniform(k4, (2048,)) > 0.5).astype(jnp.float32)
    l2 = shdlnet_cross(x2, y2, lamd=0.5, max_tile_rows=8)
    jax.block_until_ready(l2)
    r2 = _reference(x2, y2, lamd=0.5)
    assert jnp.allclose(l2, r2, rtol=1e-5, atol=1e-6), (l2, r2)

    # 3) Fast path with a partial last row-block (stale VMEM rows masked).
    n3 = 136 * 128
    x3 = jax.random.normal(k5, (n3, 1), dtype=jnp.float32)
    y3 = (jax.random.uniform(k6, (n3,)) > 0.5).astype(jnp.float32)
    l3 = shdlnet_cross(x3, y3, lamd=1.0, max_tile_rows=128)
    jax.block_until_ready(l3)
    r3 = _reference(x3, y3, lamd=1.0)
    assert jnp.allclose(l3, r3, rtol=1e-5, atol=1e-6), (l3, r3)

    # 4) bf16 logits kept narrow through HBM; ragged tail + per-core split.
    x4 = jax.random.normal(k7, (3000, 1), dtype=jnp.float32).astype(jnp.bfloat16)
    y4 = (jax.random.uniform(k8, (3000,)) > 0.5).astype(jnp.float32)
    l4 = shdlnet_cross(x4, y4, lamd=2.0, max_tile_rows=16)
    jax.block_until_ready(l4)
    r4 = _reference(x4, y4, lamd=2.0)
    assert jnp.allclose(l4, r4, rtol=1e-5, atol=1e-6), (l4, r4)

    print("KERNEL_OK")
</pallas_src>

<mosaic_0001>
module attributes {stable_mosaic.version = 11 : i64} {
  func.func @_bce_kernel(%arg0: i32, %arg1: i32, %arg2: memref<8x128xf32, #tpu.memory_space<vmem>>, %arg3: memref<8x128xf32, #tpu.memory_space<vmem>>, %arg4: memref<1x8x128xf32, #tpu.memory_space<vmem>>) attributes {dimension_semantics = [#tpu.dimension_semantics<parallel>, #tpu.dimension_semantics<arbitrary>], iteration_bounds = array<i64: 1, 1>, scalar_prefetch = 0 : i64, scratch_operands = 0 : i64, tpu.core_type = #tpu.core_type<tc>, window_params = [{transform_indices = @transform_0, window_bounds = array<i64: 8, 128>}, {transform_indices = @transform_1, window_bounds = array<i64: 8, 128>}, {transform_indices = @transform_2, window_bounds = array<i64: 1, 8, 128>}]} {
    %c1_i32 = arith.constant 1 : i32
    %0 = arith.muli %arg0, %c1_i32 : i32
    %1 = arith.addi %0, %arg1 : i32
    %c0_i32 = arith.constant 0 : i32
    %2 = arith.cmpi eq, %arg1, %c0_i32 : i32
    %3 = arith.extui %2 : i1 to i32
    %c0_i32_0 = arith.constant 0 : i32
    %4 = arith.cmpi ne, %3, %c0_i32_0 : i32
    scf.if %4 {
      %cst_9 = arith.constant 0.000000e+00 : f32
      %23 = vector.broadcast %cst_9 : f32 to vector<8x128xf32>
      %c0_10 = arith.constant 0 : index
      %c0_11 = arith.constant 0 : index
      %c0_12 = arith.constant 0 : index
      %24 = vector.load %arg4[%c0_10, %c0_11, %c0_12] : memref<1x8x128xf32, #tpu.memory_space<vmem>>, vector<1x8x128xf32>
      %25 = vector.shape_cast %24 : vector<1x8x128xf32> to vector<8x128xf32>
      %26 = vector.shape_cast %23 : vector<8x128xf32> to vector<1x8x128xf32>
      tpu.vector_store %arg4[%c0_10, %c0_11, %c0_12], %26 {strides = array<i32>} : memref<1x8x128xf32, #tpu.memory_space<vmem>>, vector<1x8x128xf32>,
    } else {
    }
    %c0 = arith.constant 0 : index
    %c0_1 = arith.constant 0 : index
    %5 = vector.load %arg2[%c0, %c0_1] : memref<8x128xf32, #tpu.memory_space<vmem>>, vector<8x128xf32>
    %c0_2 = arith.constant 0 : index
    %c0_3 = arith.constant 0 : index
    %6 = vector.load %arg3[%c0_2, %c0_3] : memref<8x128xf32, #tpu.memory_space<vmem>>, vector<8x128xf32>
    %cst = arith.constant 0.000000e+00 : f32
    %7 = vector.broadcast %cst : f32 to vector<8x128xf32>
    %8 = arith.maximumf %5, %7 : vector<8x128xf32>
    %9 = math.absf %5 : vector<8x128xf32>
    %cst_4 = arith.constant 0.000000e+00 : f32
    %10 = vector.broadcast %cst_4 : f32 to vector<8x128xf32>
    %11 = arith.subf %10, %9 : vector<8x128xf32>
    %12 = math.exp %11 : vector<8x128xf32>
    %13 = math.log1p %12 : vector<8x128xf32>
    %14 = arith.addf %8, %13 : vector<8x128xf32>
    %15 = arith.mulf %6, %5 : vector<8x128xf32>
    %16 = arith.subf %15, %14 : vector<8x128xf32>
    %c0_i32_5 = arith.constant 0 : i32
    %17 = arith.cmpi slt, %1, %c0_i32_5 : i32
    %18 = arith.extui %17 : i1 to i32
    %c0_i32_6 = arith.constant 0 : i32
    %19 = arith.cmpi ne, %18, %c0_i32_6 : i32
    scf.if %19 {
      %c0_9 = arith.constant 0 : index
      %c0_10 = arith.constant 0 : index
      %c0_11 = arith.constant 0 : index
      %23 = vector.load %arg4[%c0_9, %c0_10, %c0_11] : memref<1x8x128xf32, #tpu.memory_space<vmem>>, vector<1x8x128xf32>
      %24 = vector.shape_cast %23 : vector<1x8x128xf32> to vector<8x128xf32>
      %25 = vector.shape_cast %16 : vector<8x128xf32> to vector<1x8x128xf32>
      %cst_12 = arith.constant dense<0.000000e+00> : vector<8x128xf32>
      %26 = vector.multi_reduction <add>, %25, %cst_12 [0] : vector<1x8x128xf32> to vector<8x128xf32>
      %27 = arith.addf %24, %26 : vector<8x128xf32>
      %c0_13 = arith.constant 0 : index
      %c0_14 = arith.constant 0 : index
      %c0_15 = arith.constant 0 : index
      %28 = vector.load %arg4[%c0_13, %c0_14, %c0_15] : memref<1x8x128xf32, #tpu.memory_space<vmem>>, vector<1x8x128xf32>
      %29 = vector.shape_cast %28 : vector<1x8x128xf32> to vector<8x128xf32>
      %30 = vector.shape_cast %27 : vector<8x128xf32> to vector<1x8x128xf32>
      tpu.vector_store %arg4[%c0_13, %c0_14, %c0_15], %30 {strides = array<i32>} : memref<1x8x128xf32, #tpu.memory_space<vmem>>, vector<1x8x128xf32>,
    } else {
    }
    %c0_i32_7 = arith.constant 0 : i32
    %20 = arith.cmpi sge, %1, %c0_i32_7 : i32
    %21 = arith.extui %20 : i1 to i32
    %c0_i32_8 = arith.constant 0 : i32
    %22 = arith.cmpi ne, %21, %c0_i32_8 : i32
    scf.if %22 {
      %23 = tpu.iota {dimensions = array<i32: 0>} : vector<8x128xi32>
      %c8_i32 = arith.constant 8 : i32
      %24 = arith.muli %1, %c8_i32 : i32
      %25 = vector.broadcast %24 : i32 to vector<8x128xi32>
      %26 = arith.addi %23, %25 : vector<8x128xi32>
      %27 = tpu.iota {dimensions = array<i32: 1>} : vector<8x128xi32>
      %c0_i32_9 = arith.constant 0 : i32
      %28 = vector.broadcast %c0_i32_9 : i32 to vector<8x128xi32>
      %29 = arith.cmpi slt, %26, %28 : vector<8x128xi32>
      %c0_i32_10 = arith.constant 0 : i32
      %30 = vector.broadcast %c0_i32_10 : i32 to vector<8x128xi32>
      %31 = arith.cmpi eq, %26, %30 : vector<8x128xi32>
      %c16_i32 = arith.constant 16 : i32
      %32 = vector.broadcast %c16_i32 : i32 to vector<8x128xi32>
      %33 = arith.cmpi slt, %27, %32 : vector<8x128xi32>
      %34 = arith.andi %31, %33 : vector<8x128xi1>
      %35 = arith.ori %29, %34 : vector<8x128xi1>
      %cst_11 = arith.constant 0.000000e+00 : f32
      %36 = vector.broadcast %cst_11 : f32 to vector<8x128xf32>
      %37 = arith.select %35, %16, %36 : vector<8x128xi1>, vector<8x128xf32>
      %c0_12 = arith.constant 0 : index
      %c0_13 = arith.constant 0 : index
      %c0_14 = arith.constant 0 : index
      %38 = vector.load %arg4[%c0_12, %c0_13, %c0_14] : memref<1x8x128xf32, #tpu.memory_space<vmem>>, vector<1x8x128xf32>
      %39 = vector.shape_cast %38 : vector<1x8x128xf32> to vector<8x128xf32>
      %40 = vector.shape_cast %37 : vector<8x128xf32> to vector<1x8x128xf32>
      %cst_15 = arith.constant dense<0.000000e+00> : vector<8x128xf32>
      %41 = vector.multi_reduction <add>, %40, %cst_15 [0] : vector<1x8x128xf32> to vector<8x128xf32>
      %42 = arith.addf %39, %41 : vector<8x128xf32>
      %c0_16 = arith.constant 0 : index
      %c0_17 = arith.constant 0 : index
      %c0_18 = arith.constant 0 : index
      %43 = vector.load %arg4[%c0_16, %c0_17, %c0_18] : memref<1x8x128xf32, #tpu.memory_space<vmem>>, vector<1x8x128xf32>
      %44 = vector.shape_cast %43 : vector<1x8x128xf32> to vector<8x128xf32>
      %45 = vector.shape_cast %42 : vector<8x128xf32> to vector<1x8x128xf32>
      tpu.vector_store %arg4[%c0_16, %c0_17, %c0_18], %45 {strides = array<i32>} : memref<1x8x128xf32, #tpu.memory_space<vmem>>, vector<1x8x128xf32>,
    } else {
    }
    return
  }
  func.func @transform_0(%arg0: i32, %arg1: i32) -> (i32, i32) {
    %c1_i32 = arith.constant 1 : i32
    %0 = arith.muli %arg0, %c1_i32 : i32
    %1 = arith.addi %0, %arg1 : i32
    %c0_i32 = arith.constant 0 : i32
    %2 = arith.minsi %1, %c0_i32 : i32
    %c0_i32_0 = arith.constant 0 : i32
    %c0_i32_1 = arith.constant 0 : i32
    return %2, %c0_i32_0 : i32, i32
  }
  func.func @transform_1(%arg0: i32, %arg1: i32) -> (i32, i32) {
    %c1_i32 = arith.constant 1 : i32
    %0 = arith.muli %arg0, %c1_i32 : i32
    %1 = arith.addi %0, %arg1 : i32
    %c0_i32 = arith.constant 0 : i32
    %2 = arith.minsi %1, %c0_i32 : i32
    %c0_i32_0 = arith.constant 0 : i32
    %c0_i32_1 = arith.constant 0 : i32
    return %2, %c0_i32_0 : i32, i32
  }
  func.func @transform_2(%arg0: i32, %arg1: i32) -> (i32, i32, i32) {
    %c0_i32 = arith.constant 0 : i32
    %c0_i32_0 = arith.constant 0 : i32
    %c0_i32_1 = arith.constant 0 : i32
    return %arg0, %c0_i32, %c0_i32_0 : i32, i32, i32
  }
}

</mosaic_0001>

<bundles_post_ra>
// kernel: tpu_custom_call.1
= control target key start
LH: loop header
LB: loop body
LE: loop exit
PB: predicated region body
PF: predicated region fallthrough
CT: control target
= control target key end

     0   :  { %7 = vsyncpa [#allocation3], 0  ;;  %s245_s0 = inlined_call_operand.hbm [shape: f32[8,128], index: 0, kind: input, shape index: {}]   ;;  %s246_s1 = inlined_call_operand.hbm [shape: f32[8,128], index: 1, kind: input, shape index: {}]   ;;  %s247_s2 = inlined_call_operand.hbm [shape: f32[1,8,128], index: 2, kind: output, shape index: {}]  }
   0x1   :  { %8 = vsyncpa [#allocation6], 0 }
   0x2   :  { %9 = vsyncpa [#allocation4], 0  ;;  %s20_s11 = sshll.u32 %s245_s0, 4  ;;  %s218_s12 = smov [#allocation2]   ;;  %s21_s11 = int_to_ptr.hbm [resolvable:$true] %s20_s11 }
   0x3   :  { %s22_s13 = sshll.u32 %s218_s12, 4  ;;  %s36_s16 = sshll.u32 %s246_s1, 4  ;;  %s23_s13 = int_to_ptr.vmem [resolvable:$true] %s22_s13  ;;  %s37_s16 = int_to_ptr.hbm [resolvable:$true] %s36_s16 }
   0x4   :  { %25 = dma.hbm_to_vmem [thread:$0]  %s21_s11, 128, %s23_s13, [#allocation3]  }
   0x5   :  { %s219_s17 = smov [#allocation5]  }
   0x6   :  { %s38_s18 = sshll.u32 %s219_s17, 4  ;;  %s39_s18 = int_to_ptr.vmem [resolvable:$true] %s38_s18 }
   0x7   :  { %41 = dma.hbm_to_vmem [thread:$0]  %s37_s16, 128, %s39_s18, [#allocation6]  }
   0x8   :  { %212 = dma.done.wait [#allocation3], 128  }
   0x9   :  { %213 = vsyncadd [#allocation3], 4294967168 }
   0xa   :  { %214 = dma.done.wait [#allocation6], 128  }
   0xb   :  { %215 = vsyncadd [#allocation6], 4294967168  ;;  %v62_v0 = vld [vmem:[#allocation2] sm:$0xff]  ;;  %v93_v7 = vlaneseq  ;;  %v63_v12 = vld [vmem:[#allocation5] sm:$0xff]  ;;  %s220_s0 = smov [#allocation7]   ;;  %s117_s21 = sshll.u32 %s247_s2, 4  ;;  %s118_s21 = int_to_ptr.hbm [resolvable:$true] %s117_s21 }
   0xc   :  { %v65_v1 = vand.u32 2147483647, %v62_v0  ;;  %v64_v15 = vmax.f32 %v62_v0, 0.0  ;;  %v79_v17 = vmul.f32 %v63_v12, %v62_v0  ;;  %s115_s1 = sshll.u32 %s220_s0, 4  ;;  %s116_s1 = int_to_ptr.vmem [resolvable:$true] %s115_s1 }
   0xd   :  { %v94_v10 = vshrl.u32 %v93_v7, 7  ;;  %v99_v11 = vand.u32 127, %v93_v7 }
   0xe   :  { %v66_v2 = vsub.f32 0.0, %v65_v1 }
   0xf   :  { %vm101_vm1 = vcmp.eq.s32.totalorder %v94_v10, 0  ;;  %vm102_vm2 = vcmp.lt.s32.totalorder %v99_v11, 16 }
  0x10   :  { %v67_v3 = vmul.f32 1.442695, %v66_v2  ;;  %vm103_vm3 = vmand %vm101_vm1, %vm102_vm2 }
  0x12   :  { %136 = vpow2.f32 %v67_v3 }
  0x18   :  { %v137_v4 = vpop.eup %136 }
  0x19   :  { %v69_v5 = vadd.f32 1.0, %v137_v4  ;;  %v72_v6 = vmul.f32 -0.5, %v137_v4  ;;  %v75_v9 = vand.u32 2147483647, %v137_v4 }
  0x1b   :  { %138 = vlog2.f32 %v69_v5  ;;  %v73_v8 = vadd.f32 1.0, %v72_v6  ;;  %vm76_vm0 = vcmp.lt.f32.partialorder %v75_v9, 0.0004427343 }
  0x1d   :  { %v74_v13 = vmul.f32 %v137_v4, %v73_v8 }
  0x21   :  { %v139_v14 = vpop.eup %138 }
  0x22   :  { %v71_v16 = vmul.f32 0.6931472, %v139_v14 }
  0x24   :  { %v77_v18 = vsel %vm76_vm0, %v74_v13, %v71_v16 }
  0x25   :  { %v78_v19 = vadd.f32 %v77_v18, %v64_v15 }
  0x27   :  { %v80_v20 = vsub.f32 %v79_v17, %v78_v19 }
  0x29   :  { %v105_v21 = vsel %vm103_vm3, %v80_v20, 0.0 }
  0x2a   :  { %109 = vst [vmem:[#allocation7] sm:$0xff] %v105_v21 }
  0x2b   :  { %120 = dma.vmem_to_hbm [thread:$0]  %s116_s1, 128, %s118_s21, [#allocation4]  }
  0x2c   :  { %216 = dma.done.wait [#allocation4], 128  }
  0x2d   :  { %217 = vsyncadd [#allocation4], 4294967168 }
  0x2e   :  { %125 = vsyncpa [#allocation3], 1 }
  0x2f   :  { %126 = vsyncpa [#allocation6], 1 }
  0x30   :  { %127 = vsyncpa [#allocation4], 1 }

</bundles_post_ra>
